<compile_context>
chip_gen: v5e
topology: v5e:2x2
jax: 0.10.0
libtpu: 0.0.40
codegen_flags: <defaults>
</compile_context>

<pallas_src>
import functools
import math

import jax
import jax.numpy as jnp
from jax.experimental import pallas as pl
from jax.experimental.pallas import tpu as pltpu


def calculate_gabor_weights(freq, theta, sigma, psi, xg, yg, delta=1e-3):
    """Vectorized GaborConv2d.calculate_weights -> (Cout, Cin, KH, KW)."""
    ct = jnp.cos(theta)[..., None, None]
    st = jnp.sin(theta)[..., None, None]
    sig = sigma[..., None, None]
    f = freq[..., None, None]
    p = psi[..., None, None]
    x = xg[None, None]
    y = yg[None, None]
    rotx = x * ct + y * st
    roty = -x * st + y * ct
    g = jnp.exp(-0.5 * (rotx * rotx + roty * roty) / (sig + delta) ** 2)
    g = g * jnp.cos(f * rotx + p)
    g = g / (2.0 * math.pi * sig * sig)
    return g


def build_banded_weight(weight, input_width, dtype=jnp.float32):
    """Fold the dense OIHW weight into a lane-padded banded GEMM RHS.

    wk[w_in*Cin+ci, kh*Npad + ow*Cout + co] = weight[co, ci, kh, w_in-ow]
    (zero outside the band; Npad = Wo*Cout rounded up to a multiple of 128).
    Input-independent -> build once (this is the module's `is_calculated` cache).
    """
    c_out, c_in, kh, kw = weight.shape
    w_len = int(input_width)
    wo = w_len - kw + 1
    n_cols = wo * c_out
    n_pad = ((max(n_cols, 1) + 127) // 128) * 128          # lane-dense N
    sel = (jnp.arange(w_len)[None, :, None]
           == jnp.arange(kw)[:, None, None] + jnp.arange(wo)[None, None, :])
    sel = sel.astype(dtype)                                  # (KW, W, Wo)
    wk = jnp.einsum("kvo,cdhk->hvdoc", sel, weight.astype(dtype))
    wk = wk.reshape(kh, w_len * c_in, n_cols)
    wk = jnp.pad(wk, ((0, 0), (0, 0), (0, n_pad - n_cols)))
    # Fold KH into the lane axis: (W*Cin, KH*Npad) -> one matmul per grid step.
    wk = jnp.transpose(wk, (1, 0, 2)).reshape(w_len * c_in, kh * n_pad)
    return wk


def _pick_batch_block(batch, height, rows_target=256):
    """Batches per grid step: fill MXU rows but keep >=2 grid steps (v7x megacore)."""
    b_blk = max(1, rows_target // max(height, 1))
    if batch >= 2:
        b_blk = min(b_blk, (batch + 1) // 2)
    b_blk = max(1, min(b_blk, batch))
    while batch % b_blk:
        b_blk -= 1
    return b_blk


def _gabor_conv_kernel(x_ref, w_ref, o_ref, *, num_kh, n_pad):
    # x_ref: (Mblk, W*Cin)    batch-stacked channels-last rows (full H per image)
    # w_ref: (W*Cin, KH*Npad) resident banded weight (whole-array VMEM, KH in lanes)
    # o_ref: (Mblk, Npad)     lane-dense (multiple-of-128) output rows
    x = x_ref[...]
    prod = jnp.dot(x, w_ref[...], preferred_element_type=jnp.float32)
    m = x.shape[0]
    acc = prod[:, :n_pad]                       # kh == 0 initializes the accumulator
    for kh in range(1, num_kh):                 # static unroll (KH-1 rolled adds)
        # acc[r] += prod_kh[r + kh]; only rows r < Ho per image are kept, so the
        # cyclic wrap / cross-image rows land only in discarded padding rows.
        chunk = prod[:, kh * n_pad:(kh + 1) * n_pad]
        acc = acc + pltpu.roll(chunk, m - kh, axis=0)
    o_ref[...] = acc.astype(o_ref.dtype)


def gabor_conv2d_apply(x_nchw, wk, c_out, kernel_h, kernel_w):
    """VALID stride-1 conv given a prebuilt banded GEMM weight (cached path)."""
    B, c_in, H, W = x_nchw.shape
    Ho, Wo = H - kernel_h + 1, W - kernel_w + 1
    K = W * c_in
    n_cols = Wo * c_out
    n_pad = wk.shape[1] // kernel_h
    assert wk.shape == (K, kernel_h * n_pad)

    # Channels-last, batch stacked along GEMM rows (free reshape after transpose).
    x2 = jnp.transpose(x_nchw, (0, 2, 3, 1)).reshape(B * H, K).astype(wk.dtype)

    b_blk = _pick_batch_block(B, H)
    m_blk = b_blk * H
    grid = (B // b_blk,)

    itemsize = jnp.dtype(wk.dtype).itemsize
    vmem_need = wk.size * itemsize + 2 * m_blk * (K + n_pad) * itemsize
    vmem_limit = int(max(8 * 1024 * 1024, min(48 * 1024 * 1024, 4 * vmem_need)))

    cost = pl.CostEstimate(
        flops=2 * (B * H) * K * (kernel_h * n_pad),
        transcendentals=0,
        bytes_accessed=(x2.size + wk.size + B * H * n_pad) * itemsize,
    )

    kernel = functools.partial(_gabor_conv_kernel, num_kh=kernel_h, n_pad=n_pad)
    o2 = pl.pallas_call(
        kernel,
        out_shape=jax.ShapeDtypeStruct((B * H, n_pad), wk.dtype),
        grid_spec=pltpu.PrefetchScalarGridSpec(
            num_scalar_prefetch=0,
            grid=grid,
            in_specs=[
                pl.BlockSpec((m_blk, K), lambda b: (b, 0)),
                # Whole-array, single-buffered VMEM residency (no double-buffer).
                pl.BlockSpec(memory_space=pltpu.MemorySpace.VMEM),
            ],
            out_specs=pl.BlockSpec((m_blk, n_pad), lambda b: (b, 0)),
        ),
        compiler_params=pltpu.CompilerParams(
            dimension_semantics=("parallel",),
            vmem_limit_bytes=vmem_limit,
        ),
        cost_estimate=cost,
    )(x2, wk)

    # Drop the padded lanes / padded rows, back to NCHW.
    out = o2[:, :n_cols].reshape(B, H, Wo, c_out)[:, :Ho]
    return jnp.transpose(out, (0, 3, 1, 2))


def gabor_conv2d(x_nchw, weight):
    """VALID stride-1 conv from the dense OIHW weight (builds the band inline)."""
    c_out, _, kh, kw = weight.shape
    wk = build_banded_weight(weight, x_nchw.shape[3], x_nchw.dtype)
    return gabor_conv2d_apply(x_nchw, wk, c_out, kh, kw)


def gabor_conv2d_forward(x, freq, theta, sigma, psi, xg, yg):
    """Full GaborConv2d.forward: build filter bank, then convolve."""
    weight = calculate_gabor_weights(freq, theta, sigma, psi, xg, yg)
    return gabor_conv2d(x, weight)


if __name__ == "__main__":
    B, C_IN, H, W = 2, 4, 16, 16
    C_OUT, KH, KW = 8, 3, 3

    key = jax.random.PRNGKey(0)
    kx, kf, kt, kp = jax.random.split(key, 4)

    x = jax.random.normal(kx, (B, C_IN, H, W), dtype=jnp.float32)

    # Deterministic parameter init mirroring GaborConv2d.__init__.
    n = jax.random.randint(kf, (C_OUT, C_IN), 0, 5).astype(jnp.float32)
    freq = (math.pi / 2.0) * (math.sqrt(2.0) ** (-n))
    theta = (math.pi / 8.0) * jax.random.randint(kt, (C_OUT, C_IN), 0, 8).astype(jnp.float32)
    sigma = math.pi / freq
    psi = math.pi * jax.random.uniform(kp, (C_OUT, C_IN), dtype=jnp.float32)

    x0 = math.ceil(KH / 2)
    y0 = math.ceil(KW / 2)
    yg, xg = jnp.meshgrid(jnp.linspace(-x0 + 1.0, float(x0), KH),
                          jnp.linspace(-y0 + 1.0, float(y0), KW),
                          indexing="ij")

    # Eval-mode caching (`is_calculated`): the filter bank and the banded GEMM
    # weight are input-independent, so build them once outside the per-call jit.
    weight = calculate_gabor_weights(freq, theta, sigma, psi, xg, yg)
    wk = jax.block_until_ready(build_banded_weight(weight, W, jnp.float32))

    apply_fn = jax.jit(gabor_conv2d_apply, static_argnums=(2, 3, 4))
    out = jax.block_until_ready(apply_fn(x, wk, C_OUT, KH, KW))

    # Pure-JAX reference of the same forward.
    ref = jax.lax.conv_general_dilated(
        x, weight, window_strides=(1, 1), padding="VALID",
        dimension_numbers=("NCHW", "OIHW", "NCHW"),
        precision=jax.lax.Precision.HIGHEST)

    assert out.shape == (B, C_OUT, H - KH + 1, W - KW + 1)
    err = float(jnp.max(jnp.abs(out - ref)))
    assert jnp.allclose(out, ref, atol=1e-4, rtol=1e-4), err

    # Also exercise the uncached full-forward path once (training-mode recalc).
    out2 = jax.block_until_ready(
        jax.jit(gabor_conv2d_forward)(x, freq, theta, sigma, psi, xg, yg))
    assert jnp.allclose(out2, ref, atol=1e-4, rtol=1e-4)

    print("KERNEL_OK")
</pallas_src>

<mosaic_0001>
module attributes {stable_mosaic.version = 11 : i64} {
  func.func @_gabor_conv_kernel(%arg0: i32, %arg1: memref<16x64xf32, #tpu.memory_space<vmem>>, %arg2: memref<64x384xf32, #tpu.memory_space<vmem>>, %arg3: memref<16x128xf32, #tpu.memory_space<vmem>>) attributes {dimension_semantics = [#tpu.dimension_semantics<parallel>], iteration_bounds = array<i64: 2>, scalar_prefetch = 0 : i64, scratch_operands = 0 : i64, tpu.core_type = #tpu.core_type<tc>, window_params = [{transform_indices = @transform_0, window_bounds = array<i64: 16, 64>}, {pipeline_mode = #tpu.pipeline_mode<synchronous>, transform_indices = @transform_1, window_bounds = array<i64: 64, 384>}, {transform_indices = @transform_2, window_bounds = array<i64: 16, 128>}]} {
    %c0 = arith.constant 0 : index
    %c0_0 = arith.constant 0 : index
    %0 = vector.load %arg1[%c0, %c0_0] : memref<16x64xf32, #tpu.memory_space<vmem>>, vector<16x64xf32>
    %c0_1 = arith.constant 0 : index
    %c0_2 = arith.constant 0 : index
    %1 = vector.load %arg2[%c0_1, %c0_2] : memref<64x384xf32, #tpu.memory_space<vmem>>, vector<64x384xf32>
    %cst = arith.constant dense<0.000000e+00> : vector<16x384xf32>
    %2 = tpu.matmul %0, %1, %cst {dimension_numbers = #tpu.dot_dimension_numbers<[1], [0], [0], [1], [0, 0, 1, 1], [], []>} : vector<16x64xf32>, vector<64x384xf32>, vector<16x384xf32> -> vector<16x384xf32>
    %3 = vector.extract_strided_slice %2 {offsets = [0, 0], sizes = [16, 128], strides = [1, 1]} : vector<16x384xf32> to vector<16x128xf32>
    %4 = vector.extract_strided_slice %2 {offsets = [0, 128], sizes = [16, 128], strides = [1, 1]} : vector<16x384xf32> to vector<16x128xf32>
    %c15_i32 = arith.constant 15 : i32
    %5 = tpu.dynamic_rotate %4 by %c15_i32 dim 0 : vector<16x128xf32>, i32 -> vector<16x128xf32>
    %6 = arith.addf %3, %5 : vector<16x128xf32>
    %7 = vector.extract_strided_slice %2 {offsets = [0, 256], sizes = [16, 128], strides = [1, 1]} : vector<16x384xf32> to vector<16x128xf32>
    %c14_i32 = arith.constant 14 : i32
    %8 = tpu.dynamic_rotate %7 by %c14_i32 dim 0 : vector<16x128xf32>, i32 -> vector<16x128xf32>
    %9 = arith.addf %6, %8 : vector<16x128xf32>
    %c0_3 = arith.constant 0 : index
    %c0_4 = arith.constant 0 : index
    %10 = vector.load %arg3[%c0_3, %c0_4] : memref<16x128xf32, #tpu.memory_space<vmem>>, vector<16x128xf32>
    tpu.vector_store %arg3[%c0_3, %c0_4], %9 {strides = array<i32>} : memref<16x128xf32, #tpu.memory_space<vmem>>, vector<16x128xf32>,
    return
  }
  func.func @transform_0(%arg0: i32) -> (i32, i32) {
    %c0_i32 = arith.constant 0 : i32
    %c0_i32_0 = arith.constant 0 : i32
    return %arg0, %c0_i32 : i32, i32
  }
  func.func @transform_1(%arg0: i32) -> (i32, i32) {
    %c0_i32 = arith.constant 0 : i32
    %c0_i32_0 = arith.constant 0 : i32
    %c0_i32_1 = arith.constant 0 : i32
    return %c0_i32, %c0_i32_0 : i32, i32
  }
  func.func @transform_2(%arg0: i32) -> (i32, i32) {
    %c0_i32 = arith.constant 0 : i32
    %c0_i32_0 = arith.constant 0 : i32
    return %arg0, %c0_i32 : i32, i32
  }
}

</mosaic_0001>

<bundles_post_ra>
// kernel: gabor_conv2d_apply.1
= control target key start
LH: loop header
LB: loop body
LE: loop exit
PB: predicated region body
PF: predicated region fallthrough
CT: control target
= control target key end

     0   :  { %s379_s9 = smov 0   ;;  %s481_s0 = inlined_call_operand.vmem [shape: f32[32,64], index: 0, kind: input, shape index: {}]   ;;  %s482_s1 = inlined_call_operand.vmem [shape: f32[64,384], index: 1, kind: input, shape index: {}]   ;;  %s483_s2 = inlined_call_operand.vmem [shape: f32[32,128], index: 2, kind: output, shape index: {}]  }
   0x1 LB: > { %s323_s10 = sadd.s32 4294967295, %s362_s9   ;;  %p327_p0 = scmp.ge.s32.totalorder %s362_s9, 1  ;;  %s362_s9 = sphi %s379_s9, %s12_s9  }
   0x2   : > { %p113_p1 = scmp.lt.s32.totalorder %s362_s9, 3 }
   0x4   : > { %p114_p2 = pnand %p327_p0, %p113_p1 }
   0x5   : > { %s328_s17 = sshll.u32 (!%p114_p2), %s323_s10, 1 }
   0x6   : > { %117 = sbr.rel (%p114_p2) target bundleno = 174 (0xae), region = 28  ;;  %p136_p3 = scmp.lt.s32.totalorder (!%p114_p2), %s328_s17, 3 }
   0xb   : > { %v171_v0 = vld [vmem:[%s482_s1 + $0xb0] sm:$0xff]  ;;  %v172_v1 = vld [vmem:[%s482_s1 + $0xb8] sm:$0xff]  ;;  %v169_v3 = vld [vmem:[%s482_s1 + $0xa0] sm:$0xff]  ;;  %s485_s17 = smov (!%p136_p3, %s328_s17), 3  ;;  %vm173_vm0 = vcmask 523264   ;;  %v251_v27 = vlaneseq }
   0xc   : > { %v168_v2 = vld [vmem:[%s482_s1 + $0x98] sm:$0xff]  ;;  %211 = vmatpush.msra.mxu1 %v171_v0  ;;  %234 = vmatpush.msra.mxu2 %v172_v1  ;;  %v165_v4 = vld [vmem:[%s482_s1 + $0x80] sm:$0xff]  ;;  %v166_v5 = vld [vmem:[%s482_s1 + $0x88] sm:$0xff]  ;;  %s329_s13 = sshll.u32 %s485_s17, 3 }
   0xd   : > { %v170_v6 = vld [vmem:[%s482_s1 + $0xa8] sm:$0xff]  ;;  %v167_v7 = vld [vmem:[%s482_s1 + $0x90] sm:$0xff]  ;;  %v164_v10 = vld [vmem:[%s482_s1 + $0x78] sm:$0xff]  ;;  %s139_s27 = scalar_lea.vmem %s481_s0, %s329_s13  ;;  %v252_v29 = vshrl.u32 %v251_v27, 7  ;;  %s145_s14 = scalar_lea.vmem %s483_s2, %s329_s13 }
   0xe   : > { %212 = vmatpush.msra.mxu1 %v168_v2  ;;  %235 = vmatpush.msra.mxu2 %v169_v3  ;;  %v162_v8 = vld [vmem:[%s482_s1 + $0x68] sm:$0xff]  ;;  %v163_v9 = vld [vmem:[%s482_s1 + $0x70] sm:$0xff]  ;;  %v160_v12 = vld [vmem:[%s482_s1 + $0x58] sm:$0xff] }
   0xf   : > { %340 = vmatpush.msra.mxu3 %v170_v6  ;;  %188 = vmatpush.msra.mxu0 %v170_v6  ;;  %v159_v11 = vld [vmem:[%s482_s1 + $0x50] sm:$0xff]  ;;  %v161_v13 = vld [vmem:[%s482_s1 + $0x60] sm:$0xff]  ;;  %v156_v14 = vld [vmem:[%s482_s1 + $0x38] sm:$0xff]  ;;  %vm253_vm1 = vcmp.lt.s32.totalorder %v252_v29, 7  ;;  %vm260_vm2 = vcmp.lt.s32.totalorder %v252_v29, 6 }
  0x10   : > { %213 = vmatpush.msra.mxu1 %v165_v4  ;;  %236 = vmatpush.msra.mxu2 %v166_v5  ;;  %v157_v15 = vld [vmem:[%s482_s1 + $0x40] sm:$0xff]  ;;  %v158_v16 = vld [vmem:[%s482_s1 + $0x48] sm:$0xff]  ;;  %v155_v19 = vld [vmem:[%s482_s1 + $0x30] sm:$0xff] }
  0x11   : > { %341 = vmatpush.msra.mxu3 %v167_v7  ;;  %189 = vmatpush.msra.mxu0 %v167_v7  ;;  %v153_v17 = vld [vmem:[%s482_s1 + $0x20] sm:$0xff]  ;;  %v154_v18 = vld [vmem:[%s482_s1 + $0x28] sm:$0xff]  ;;  %v151_v21 = vld [vmem:[%s482_s1 + $0x10] sm:$0xff] }
  0x12   : > { %214 = vmatpush.msra.mxu1 %v162_v8  ;;  %237 = vmatpush.msra.mxu2 %v163_v9  ;;  %v150_v20 = vld [vmem:[%s482_s1 + $0x8] sm:$0xff]  ;;  %v147_v22 = vld [vmem:[%s139_s27] sm:$0xff]  ;;  %v152_v23 = vld [vmem:[%s482_s1 + $0x18] sm:$0xff] }
  0x13   : > { %342 = vmatpush.msra.mxu3 %v164_v10  ;;  %190 = vmatpush.msra.mxu0 %v164_v10  ;;  %v149_v24 = vld [vmem:[%s482_s1] sm:$0xff]  ;;  %v148_v25 = vld [vmem:[%s139_s27 + $0x8] sm:$0xff] }
  0x14   : > { %215 = vmatpush.msra.mxu1 %v159_v11  ;;  %238 = vmatpush.msra.mxu2 %v160_v12 }
  0x15   : > { %343 = vmatpush.msra.mxu3 %v161_v13  ;;  %191 = vmatpush.msra.mxu0 %v161_v13 }
  0x16   : > { %216 = vmatpush.msra.mxu1 %v156_v14  ;;  %239 = vmatpush.msra.mxu2 %v157_v15 }
  0x17   : > { %344 = vmatpush.msra.mxu3 %v158_v16  ;;  %192 = vmatpush.msra.mxu0 %v158_v16 }
  0x18   : > { %217 = vmatpush.msra.mxu1 %v153_v17  ;;  %240 = vmatpush.msra.mxu2 %v154_v18 }
  0x19   : > { %345 = vmatpush.msra.mxu3 %v155_v19  ;;  %193 = vmatpush.msra.mxu0 %v155_v19 }
  0x1a   : > { %218 = vmatpush.msra.mxu1 %v150_v20  ;;  %241 = vmatpush.msra.mxu2 %v151_v21 }
  0x1b   : > { %334 = vmatmul.msk.f32.vlgmr.msra.gmra.mxu1 %vm173_vm0, %v147_v22  ;;  %336 = vmatmul.msk.f32.vlgmr.msra.gmra.mxu2 %vm173_vm0, %v147_v22 }
  0x1c   : > { %346 = vmatpush.msra.mxu3 %v152_v23  ;;  %194 = vmatpush.msra.mxu0 %v152_v23 }
  0x1e   : > { %347 = vmatpush.msra.mxu3 %v149_v24  ;;  %195 = vmatpush.msra.mxu0 %v149_v24 }
  0x1f   : > { %333 = vmatmul.msk.f32.vlgmr.msra.gmra.mxu3 %vm173_vm0, %v148_v25  ;;  %332 = vmatmul.msk.f32.vlgmr.msra.gmra.mxu0 %vm173_vm0, %v147_v22 }
  0x23   : > { %335 = vmatmul.msk.f32.gmra.mxu1 %vm173_vm0, %v148_v25  ;;  %337 = vmatmul.msk.f32.gmra.mxu2 %vm173_vm0, %v148_v25 }
  0x98   : > { %v220_v26 = vpop.f32.mrf.mxu1 }
  0x99   : > { %v249_v32 = vrot.slane %v220_v26, 1 }
  0x9c   : > { %v197_v33 = vpop.f32.mrf.mxu0 }
  0x9e   : > { %v243_v28 = vpop.f32.mrf.mxu2 }
  0x9f   : > { %v258_v38 = vrot.slane %v243_v28, 2 }
  0xa0   : > { %v223_v30 = vpop.f32.mrf.mxu1 }
  0xa1   : > { %v250_v31 = vrot.slane %v223_v30, 1 }
  0xa2   : > { %v200_v35 = vpop.f32.mrf.mxu3 }
  0xa3   : > { %v254_v34 = vsel %vm253_vm1, %v249_v32, %v250_v31  ;;  %v255_v36 = vsel %vm253_vm1, %v250_v31, %v249_v32 }
  0xa4   : > { %v256_v40 = vadd.f32 %v254_v34, %v197_v33  ;;  %v257_v41 = vadd.f32 %v255_v36, %v200_v35 }
  0xa6   : > { %v246_v37 = vpop.f32.mrf.mxu2 }
  0xa7   : > { %v259_v39 = vrot.slane %v246_v37, 2 }
  0xa9   : > { %v261_v42 = vsel %vm260_vm2, %v258_v38, %v259_v39  ;;  %v262_v43 = vsel %vm260_vm2, %v259_v39, %v258_v38 }
  0xaa   : > { %v263_v44 = vadd.f32 %v261_v42, %v256_v40  ;;  %v264_v45 = vadd.f32 %v262_v43, %v257_v41 }
  0xac   : > { %265 = vst [vmem:[%s145_s14] sm:$0xff] %v263_v44 }
  0xad   : > { %266 = vst [vmem:[%s145_s14 + $0x8] sm:$0xff] %v264_v45 }
  0xae PF: > { %s12_s9 = sadd.s32 1, %s362_s9  }
  0xaf   : > { %p9_p4 = scmp.ge.s32.totalorder %s12_s9, 4  }
  0xb1   :  { %11 = sbr.rel (!%p9_p4) target bundleno = 1 (0x1), region = 58 }

</bundles_post_ra>
